<compile_context>
chip_gen: v7x
topology: tpu7x:2x2x1
jax: 0.10.0
libtpu: 0.0.40
codegen_flags: <defaults>
</compile_context>

<pallas_src>
import functools
import math

import jax
import jax.numpy as jnp
from jax.experimental import pallas as pl
from jax.experimental.pallas import tpu as pltpu


def _round_up(a, b):
    return ((a + b - 1) // b) * b


def _round_down(a, b):
    return (a // b) * b


def _tpu_generation():
    """Best-effort chip generation from device_kind (None if unknown)."""
    try:
        kind = jax.devices()[0].device_kind.lower()
    except Exception:
        return None
    for gen in (7, 6, 5, 4, 3):
        if f"v{gen}" in kind:
            return gen
    return None


def _argmax_last_kernel(x_ref, o_ref, m_scratch, i_scratch, *,
                        n_total, tk, mask_tail, compute_dtype):
    """Grid = (row tiles ["parallel"], reduction tiles ["arbitrary"]).

    x_ref:     (tm, tk) input block
    o_ref:     (tm, 1)  int32 output block (same block revisited across k)
    m_scratch: (tm, 1)  f32 running row maximum
    i_scratch: (tm, 1)  int32 running argmax (global column index)
    """
    k = pl.program_id(1)
    last_k = pl.num_programs(1) - 1

    @pl.when(k == 0)
    def _init():
        m_scratch[...] = jnp.full(m_scratch.shape, -jnp.inf, dtype=m_scratch.dtype)
        i_scratch[...] = jnp.zeros(i_scratch.shape, dtype=i_scratch.dtype)

    x = x_ref[...]
    if x.dtype != compute_dtype:
        x = x.astype(compute_dtype)
    # torch/np treat NaN as maximal: map NaN -> +inf so a NaN row yields an
    # in-range index (the first NaN) instead of an out-of-range sentinel.
    # TODO(synk): a row holding +inf before a later NaN returns the +inf index
    # (torch would return the NaN index) -- acceptable edge case.
    x = jnp.where(jnp.isnan(x), jnp.array(jnp.inf, compute_dtype), x)

    # (1, tk) lane iota; broadcasts along sublanes in the compares below.
    col_row = jax.lax.broadcasted_iota(jnp.int32, (1, tk), dimension=1)
    neg_inf = jnp.array(-jnp.inf, compute_dtype)

    def _combine(xv):
        blk_max = jnp.max(xv, axis=-1, keepdims=True)                  # (tm, 1)
        # First local index attaining the block max (first-occurrence tie-break).
        cand = jnp.where(xv == blk_max, col_row, jnp.int32(tk))        # (tm, tk) i32
        blk_idx = jnp.min(cand, axis=-1, keepdims=True) + k * tk       # (tm, 1) global
        bm32 = blk_max.astype(jnp.float32)
        m_prev = m_scratch[...]
        better = bm32 > m_prev          # strict '>' keeps earlier block on ties
        m_scratch[...] = jnp.maximum(m_prev, bm32)
        i_scratch[...] = jnp.where(better, blk_idx, i_scratch[...])

    if mask_tail:
        # Only the last reduction block can extend past N: pay the mask there only.
        @pl.when(k != last_k)
        def _full_block():
            _combine(x)

        @pl.when(k == last_k)
        def _tail_block():
            lim = n_total - k * tk
            _combine(jnp.where(col_row < lim, x, neg_inf))
    else:
        _combine(x)

    @pl.when(k == last_k)
    def _finalize():
        o_ref[...] = i_scratch[...]


_TARGET_BLOCK_BYTES = 2 * 1024 * 1024      # v5e/v6e: ~2 MiB per input block
_TARGET_BLOCK_BYTES_V7 = 4 * 1024 * 1024   # v7x: faster HBM -> larger blocks
_TK_CAP = 8192                             # reduction-axis tile cap (multiple of 128)
_TM_CAP = 1024                             # row-axis tile cap


def argmax_last_dim(x, *, force_pallas=False):
    """Equivalent of torch.argmax(x, dim=-1); returns int32 indices."""
    # TODO(synk): PyTorch returns int64 indices; int32 used here (JAX x64 off).
    lead_shape = x.shape[:-1]
    n = x.shape[-1]
    m = math.prod(lead_shape)

    supported = x.dtype in (jnp.float32, jnp.bfloat16, jnp.float16)
    if not supported or m == 0 or (not force_pallas and (n < 256 or m < 8)):
        # Small reduction width / tiny batch / exotic dtype: XLA's fused argmax
        # wins (fixed per-grid-step overhead, mostly-empty vregs otherwise).
        return jnp.argmax(x, axis=-1).astype(jnp.int32)

    gen = _tpu_generation()
    multi_tc = gen in (4, 7)               # chips with >1 TensorCore per chip
    native_lowp_valu = gen is not None and gen >= 6

    x2d = x.reshape(m, n)
    itemsize = jnp.dtype(x.dtype).itemsize
    sub = 8 if itemsize >= 4 else 16       # sublane granule (f32 vs bf16/f16 packing)

    # Compute dtype: native bf16/f16 on v6e/v7x (halves VPU work + vreg use);
    # f32 upcast on v5e / unknown chips or for f32 inputs.
    if x.dtype == jnp.float32 or not native_lowp_valu:
        compute_dtype = jnp.float32
    else:
        compute_dtype = x.dtype

    # Reduction (lane) tile: full width when it fits, else a capped tile with
    # in-kernel masking of the ragged tail (last reduction block only).
    tk = n if n <= _TK_CAP else _TK_CAP
    mask_tail = (n % tk) != 0
    num_red_tiles = pl.cdiv(n, tk)

    # Row (sublane) tile: aim for ~target bytes per input block.
    target_bytes = _TARGET_BLOCK_BYTES_V7 if gen == 7 else _TARGET_BLOCK_BYTES
    tm = _round_down(max(target_bytes // (tk * itemsize), sub), sub)
    tm = max(sub, min(_TM_CAP, tm))
    if multi_tc and m >= 2 * sub:
        # Guarantee >= 2 row tiles so the "parallel" axis shards across both TCs.
        tm = min(tm, _round_up(pl.cdiv(m, 2), sub))
    tm = min(tm, _round_up(m, sub))

    num_row_tiles = pl.cdiv(m, tm)
    m_pad = num_row_tiles * tm             # padded tail rows computed then discarded

    kernel = functools.partial(
        _argmax_last_kernel,
        n_total=n, tk=tk, mask_tail=mask_tail, compute_dtype=compute_dtype,
    )

    # Input spec; on v7x request 3-deep buffering (guarded for API availability).
    in_index_map = lambda i, k: (i, k)
    in_spec = None
    if gen == 7:
        try:
            in_spec = pl.BlockSpec((tm, tk), in_index_map,
                                   pipeline_mode=pl.Buffered(3))
        except TypeError:
            in_spec = None
    if in_spec is None:
        in_spec = pl.BlockSpec((tm, tk), in_index_map)

    vmem_limit = (48 if gen == 7 else 32) * 1024 * 1024

    out2d = pl.pallas_call(
        kernel,
        out_shape=jax.ShapeDtypeStruct((m_pad, 1), jnp.int32),
        grid_spec=pltpu.PrefetchScalarGridSpec(
            num_scalar_prefetch=0,
            grid=(num_row_tiles, num_red_tiles),
            in_specs=[in_spec],
            out_specs=pl.BlockSpec((tm, 1), lambda i, k: (i, 0)),
            scratch_shapes=[
                pltpu.VMEM((tm, 1), jnp.float32),   # running row max
                pltpu.VMEM((tm, 1), jnp.int32),     # running argmax
            ],
        ),
        compiler_params=pltpu.CompilerParams(
            dimension_semantics=("parallel", "arbitrary"),
            vmem_limit_bytes=vmem_limit,
        ),
    )(x2d)

    return out2d[:m, 0].reshape(lead_shape)


if __name__ == "__main__":
    root = jax.random.PRNGKey(0)
    k0, k1, k2, k3 = jax.random.split(root, 4)

    # 1) Module-consistent small input (batch=2, channels=4, 16x16).  N=16 is
    #    below the Pallas threshold -> default path uses XLA argmax; also force
    #    the Pallas path to exercise the kernel at tiny N.
    x_small = jax.random.normal(k0, (2, 4, 16, 16), dtype=jnp.float32)
    ref_small = jnp.argmax(x_small, axis=-1).astype(jnp.int32)
    out_small = argmax_last_dim(x_small)
    out_small_forced = argmax_last_dim(x_small, force_pallas=True)
    jax.block_until_ready((out_small, out_small_forced))
    assert out_small.shape == ref_small.shape, (out_small.shape, ref_small.shape)
    assert bool(jnp.all(out_small == ref_small)), "mismatch (small, fallback path)"
    assert bool(jnp.all(out_small_forced == ref_small)), "mismatch (small, pallas path)"

    # 2) Single reduction tile, ragged M (row-padding path exercised).
    x_mid = jax.random.normal(k1, (2, 3, 77, 520), dtype=jnp.float32)
    ref_mid = jnp.argmax(x_mid, axis=-1).astype(jnp.int32)
    out_mid = argmax_last_dim(x_mid)
    jax.block_until_ready(out_mid)
    assert out_mid.shape == ref_mid.shape, (out_mid.shape, ref_mid.shape)
    assert bool(jnp.all(out_mid == ref_mid)), "mismatch (multi row-tile case)"

    # 3) Tiled reduction axis (N > TK cap) with ragged tail -> exercises the
    #    scratch carry, pl.when init/finalize and the last-block tail mask.
    x_wide = jax.random.normal(k2, (50, 9000), dtype=jnp.float32)
    ref_wide = jnp.argmax(x_wide, axis=-1).astype(jnp.int32)
    out_wide = argmax_last_dim(x_wide)
    jax.block_until_ready(out_wide)
    assert out_wide.shape == ref_wide.shape, (out_wide.shape, ref_wide.shape)
    assert bool(jnp.all(out_wide == ref_wide)), "mismatch (tiled reduction case)"

    # 4) bf16 input -> native low-precision compute path on v6e/v7x, upcast on v5e.
    x_bf16 = jax.random.normal(k3, (8, 40, 640), dtype=jnp.bfloat16)
    ref_bf16 = jnp.argmax(x_bf16, axis=-1).astype(jnp.int32)
    out_bf16 = argmax_last_dim(x_bf16)
    jax.block_until_ready(out_bf16)
    assert out_bf16.shape == ref_bf16.shape, (out_bf16.shape, ref_bf16.shape)
    assert bool(jnp.all(out_bf16 == ref_bf16)), "mismatch (bf16 case)"

    print("KERNEL_OK")
</pallas_src>

<mosaic_0001>
module attributes {stable_mosaic.version = 11 : i64} {
  func.func @_argmax_last_kernel(%arg0: i32, %arg1: i32, %arg2: memref<128x16xf32, #tpu.memory_space<vmem>>, %arg3: memref<128x1xi32, #tpu.memory_space<vmem>>, %arg4: memref<128x1xf32, #tpu.memory_space<vmem>>, %arg5: memref<128x1xi32, #tpu.memory_space<vmem>>) attributes {dimension_semantics = [#tpu.dimension_semantics<parallel>, #tpu.dimension_semantics<arbitrary>], iteration_bounds = array<i64: 1, 1>, scalar_prefetch = 0 : i64, scratch_operands = 2 : i64, tpu.core_type = #tpu.core_type<tc>, window_params = [{transform_indices = @transform_0, window_bounds = array<i64: 128, 16>}, {transform_indices = @transform_1, window_bounds = array<i64: 128, 1>}]} {
    %c0_i32 = arith.constant 0 : i32
    %0 = arith.cmpi eq, %arg1, %c0_i32 : i32
    %1 = arith.extui %0 : i1 to i32
    %c0_i32_0 = arith.constant 0 : i32
    %2 = arith.cmpi ne, %1, %c0_i32_0 : i32
    scf.if %2 {
      %cst_15 = arith.constant 0xFF800000 : f32
      %31 = vector.broadcast %cst_15 : f32 to vector<128x1xf32>
      %c0_16 = arith.constant 0 : index
      %c0_17 = arith.constant 0 : index
      %32 = vector.load %arg4[%c0_16, %c0_17] : memref<128x1xf32, #tpu.memory_space<vmem>>, vector<128x1xf32>
      tpu.vector_store %arg4[%c0_16, %c0_17], %31 {strides = array<i32>} : memref<128x1xf32, #tpu.memory_space<vmem>>, vector<128x1xf32>,
      %c0_i32_18 = arith.constant 0 : i32
      %33 = vector.broadcast %c0_i32_18 : i32 to vector<128x1xi32>
      %c0_19 = arith.constant 0 : index
      %c0_20 = arith.constant 0 : index
      %34 = vector.load %arg5[%c0_19, %c0_20] : memref<128x1xi32, #tpu.memory_space<vmem>>, vector<128x1xi32>
      tpu.vector_store %arg5[%c0_19, %c0_20], %33 {strides = array<i32>} : memref<128x1xi32, #tpu.memory_space<vmem>>, vector<128x1xi32>,
    } else {
    }
    %c0 = arith.constant 0 : index
    %c0_1 = arith.constant 0 : index
    %3 = vector.load %arg2[%c0, %c0_1] : memref<128x16xf32, #tpu.memory_space<vmem>>, vector<128x16xf32>
    %4 = arith.cmpf one, %3, %3 : vector<128x16xf32>
    %cst = arith.constant 0x7F800000 : f32
    %5 = vector.broadcast %cst : f32 to vector<128x16xf32>
    %6 = arith.select %4, %5, %3 : vector<128x16xi1>, vector<128x16xf32>
    %7 = tpu.iota {dimensions = array<i32: 1>} : vector<1x16xi32>
    %cst_2 = arith.constant dense<0xFF800000> : vector<128xf32>
    %8 = vector.multi_reduction <maximumf>, %6, %cst_2 [1] : vector<128x16xf32> to vector<128xf32>
    %9 = vector.shape_cast %8 : vector<128xf32> to vector<128x1xf32>
    %10 = vector.broadcast %9 : vector<128x1xf32> to vector<128x16xf32>
    %11 = arith.cmpf oeq, %6, %10 : vector<128x16xf32>
    %c16_i32 = arith.constant 16 : i32
    %12 = vector.shape_cast %7 : vector<1x16xi32> to vector<1x16xi32>
    %13 = vector.broadcast %12 : vector<1x16xi32> to vector<128x16xi32>
    %14 = vector.broadcast %c16_i32 : i32 to vector<128x16xi32>
    %15 = arith.select %11, %13, %14 : vector<128x16xi1>, vector<128x16xi32>
    %cst_3 = arith.constant dense<2147483647> : vector<128xi32>
    %16 = vector.multi_reduction <minsi>, %15, %cst_3 [1] : vector<128x16xi32> to vector<128xi32>
    %17 = vector.shape_cast %16 : vector<128xi32> to vector<128x1xi32>
    %c16_i32_4 = arith.constant 16 : i32
    %18 = arith.muli %arg1, %c16_i32_4 : i32
    %19 = vector.broadcast %18 : i32 to vector<128x1xi32>
    %20 = arith.addi %17, %19 : vector<128x1xi32>
    %c0_5 = arith.constant 0 : index
    %c0_6 = arith.constant 0 : index
    %21 = vector.load %arg4[%c0_5, %c0_6] : memref<128x1xf32, #tpu.memory_space<vmem>>, vector<128x1xf32>
    %22 = arith.cmpf ogt, %9, %21 : vector<128x1xf32>
    %23 = arith.maximumf %21, %9 : vector<128x1xf32>
    %c0_7 = arith.constant 0 : index
    %c0_8 = arith.constant 0 : index
    %24 = vector.load %arg4[%c0_7, %c0_8] : memref<128x1xf32, #tpu.memory_space<vmem>>, vector<128x1xf32>
    tpu.vector_store %arg4[%c0_7, %c0_8], %23 {strides = array<i32>} : memref<128x1xf32, #tpu.memory_space<vmem>>, vector<128x1xf32>,
    %c0_9 = arith.constant 0 : index
    %c0_10 = arith.constant 0 : index
    %25 = vector.load %arg5[%c0_9, %c0_10] : memref<128x1xi32, #tpu.memory_space<vmem>>, vector<128x1xi32>
    %26 = arith.select %22, %20, %25 : vector<128x1xi1>, vector<128x1xi32>
    %c0_11 = arith.constant 0 : index
    %c0_12 = arith.constant 0 : index
    %27 = vector.load %arg5[%c0_11, %c0_12] : memref<128x1xi32, #tpu.memory_space<vmem>>, vector<128x1xi32>
    tpu.vector_store %arg5[%c0_11, %c0_12], %26 {strides = array<i32>} : memref<128x1xi32, #tpu.memory_space<vmem>>, vector<128x1xi32>,
    %c0_i32_13 = arith.constant 0 : i32
    %28 = arith.cmpi eq, %arg1, %c0_i32_13 : i32
    %29 = arith.extui %28 : i1 to i32
    %c0_i32_14 = arith.constant 0 : i32
    %30 = arith.cmpi ne, %29, %c0_i32_14 : i32
    scf.if %30 {
      %c0_15 = arith.constant 0 : index
      %c0_16 = arith.constant 0 : index
      %31 = vector.load %arg5[%c0_15, %c0_16] : memref<128x1xi32, #tpu.memory_space<vmem>>, vector<128x1xi32>
      %c0_17 = arith.constant 0 : index
      %c0_18 = arith.constant 0 : index
      %32 = vector.load %arg3[%c0_17, %c0_18] : memref<128x1xi32, #tpu.memory_space<vmem>>, vector<128x1xi32>
      tpu.vector_store %arg3[%c0_17, %c0_18], %31 {strides = array<i32>} : memref<128x1xi32, #tpu.memory_space<vmem>>, vector<128x1xi32>,
    } else {
    }
    return
  }
  func.func @transform_0(%arg0: i32, %arg1: i32) -> (i32, i32) {
    %c0_i32 = arith.constant 0 : i32
    return %arg0, %arg1 : i32, i32
  }
  func.func @transform_1(%arg0: i32, %arg1: i32) -> (i32, i32) {
    %c0_i32 = arith.constant 0 : i32
    %c0_i32_0 = arith.constant 0 : i32
    return %arg0, %c0_i32 : i32, i32
  }
}

</mosaic_0001>

<bundles_post_ra>
// kernel: tpu_custom_call.1
= control target key start
LH: loop header
LB: loop body
LE: loop exit
PB: predicated region body
PF: predicated region fallthrough
CT: control target
= control target key end

     0   :  { %vm12_vm0 = vcmask 7168   ;;  %vm95_vm1 = vcmask 130048   ;;  %v588_v3 = vmov -inf   ;;  %v93_v49 = vlaneseq  ;;  %s1268_s0 = inlined_call_operand.vmem [shape: f32[128,16], index: 0, kind: input, shape index: {}]   ;;  %s1269_s1 = inlined_call_operand.vmem [shape: s32[128,1], index: 1, kind: output, shape index: {}]  }
   0x1   :  { %v45_v0 = vld [vmem:[%s1268_s0] sm:$0xff]  ;;  %v47_v1 = vld [vmem:[%s1268_s0 + $0x10] sm:$0xff]  ;;  %v46_v2 = vld [vmem:[%s1268_s0 + $0x8] sm:$0xff]  ;;  %13 = vst.msk [vmem:[#allocation2] sm:$0xff] %vm12_vm0, %v588_v3 }
   0x2   :  { %14 = vst.msk [vmem:[#allocation2 + $0x8] sm:$0xff] %vm12_vm0, %v588_v3  ;;  %15 = vst.msk [vmem:[#allocation2 + $0x10] sm:$0xff] %vm12_vm0, %v588_v3  ;;  %vm61_vm2 = vcmp.ne.f32.partialorder %v45_v0, %v45_v0  ;;  %vm63_vm3 = vcmp.ne.f32.partialorder %v47_v1, %v47_v1  ;;  %vm62_vm4 = vcmp.ne.f32.partialorder %v46_v2, %v46_v2  ;;  %v48_v4 = vld [vmem:[%s1268_s0 + $0x18] sm:$0xff]  ;;  %v49_v5 = vld [vmem:[%s1268_s0 + $0x20] sm:$0xff]  ;;  %v730_v51 = vand.u32 127, %v93_v49 }
   0x3   :  { %16 = vst.msk [vmem:[#allocation2 + $0x18] sm:$0xff] %vm12_vm0, %v588_v3  ;;  %17 = vst.msk [vmem:[#allocation2 + $0x20] sm:$0xff] %vm12_vm0, %v588_v3  ;;  %v50_v6 = vld [vmem:[%s1268_s0 + $0x28] sm:$0xff]  ;;  %v634_v7 = vsel %vm61_vm2, inf, %v45_v0  ;;  %v636_v8 = vsel %vm63_vm3, inf, %v47_v1  ;;  %v638_v9 = vsel %vm62_vm4, inf, %v46_v2  ;;  %vm64_vm5 = vcmp.ne.f32.partialorder %v48_v4, %v48_v4 }
   0x4   :  { %18 = vst.msk [vmem:[#allocation2 + $0x28] sm:$0xff] %vm12_vm0, %v588_v3  ;;  %19 = vst.msk [vmem:[#allocation2 + $0x30] sm:$0xff] %vm12_vm0, %v588_v3  ;;  %v96_v10 = vsel %vm95_vm1, %v634_v7, -inf  ;;  %v102_v11 = vsel %vm95_vm1, %v636_v8, -inf  ;;  %v644_v12 = vsel %vm64_vm5, inf, %v48_v4  ;;  %vm65_vm6 = vcmp.ne.f32.partialorder %v49_v5, %v49_v5  ;;  %v51_v13 = vld [vmem:[%s1268_s0 + $0x30] sm:$0xff] }
   0x5   :  { %20 = vst.msk [vmem:[#allocation2 + $0x38] sm:$0xff] %vm12_vm0, %v588_v3  ;;  %21 = vst.msk [vmem:[#allocation2 + $0x40] sm:$0xff] %vm12_vm0, %v588_v3  ;;  %97 = vmax.xlane.f32.xlu0 %v96_v10  ;;  %103 = vmax.xlane.f32.xlu1 %v102_v11  ;;  %vm66_vm7 = vcmp.ne.f32.partialorder %v50_v6, %v50_v6  ;;  %v52_v14 = vld [vmem:[%s1268_s0 + $0x38] sm:$0xff]  ;;  %v99_v15 = vsel %vm95_vm1, %v638_v9, -inf  ;;  %v105_v16 = vsel %vm95_vm1, %v644_v12, -inf  ;;  %v656_v17 = vsel %vm65_vm6, inf, %v49_v5 }
   0x6   :  { %22 = vst.msk [vmem:[#allocation2 + $0x48] sm:$0xff] %vm12_vm0, %v588_v3  ;;  %23 = vst.msk [vmem:[#allocation2 + $0x50] sm:$0xff] %vm12_vm0, %v588_v3  ;;  %v658_v18 = vsel %vm66_vm7, inf, %v50_v6  ;;  %vm67_vm8 = vcmp.ne.f32.partialorder %v51_v13, %v51_v13  ;;  %vm68_vm9 = vcmp.ne.f32.partialorder %v52_v14, %v52_v14  ;;  %v53_v19 = vld [vmem:[%s1268_s0 + $0x40] sm:$0xff]  ;;  %v54_v20 = vld [vmem:[%s1268_s0 + $0x48] sm:$0xff]  ;;  %v108_v21 = vsel %vm95_vm1, %v656_v17, -inf }
   0x7   :  { %24 = vst.msk [vmem:[#allocation2 + $0x58] sm:$0xff] %vm12_vm0, %v588_v3  ;;  %25 = vst.msk [vmem:[#allocation2 + $0x60] sm:$0xff] %vm12_vm0, %v588_v3  ;;  %v111_v22 = vsel %vm95_vm1, %v658_v18, -inf  ;;  %v670_v23 = vsel %vm67_vm8, inf, %v51_v13  ;;  %v672_v24 = vsel %vm68_vm9, inf, %v52_v14  ;;  %vm69_vm10 = vcmp.ne.f32.partialorder %v53_v19, %v53_v19  ;;  %v55_v25 = vld [vmem:[%s1268_s0 + $0x50] sm:$0xff] }
   0x8   :  { %26 = vst.msk [vmem:[#allocation2 + $0x68] sm:$0xff] %vm12_vm0, %v588_v3  ;;  %27 = vst.msk [vmem:[#allocation2 + $0x70] sm:$0xff] %vm12_vm0, %v588_v3  ;;  %vm70_vm11 = vcmp.ne.f32.partialorder %v54_v20, %v54_v20  ;;  %v56_v26 = vld [vmem:[%s1268_s0 + $0x58] sm:$0xff]  ;;  %v114_v27 = vsel %vm95_vm1, %v670_v23, -inf  ;;  %v117_v28 = vsel %vm95_vm1, %v672_v24, -inf  ;;  %v684_v29 = vsel %vm69_vm10, inf, %v53_v19 }
   0x9   :  { %28 = vst.msk [vmem:[#allocation2 + $0x78] sm:$0xff] %vm12_vm0, %v588_v3  ;;  %100 = vmax.xlane.f32.xlu0 %v99_v15  ;;  %106 = vmax.xlane.f32.xlu1 %v105_v16  ;;  %v686_v30 = vsel %vm70_vm11, inf, %v54_v20  ;;  %vm71_vm12 = vcmp.ne.f32.partialorder %v55_v25, %v55_v25  ;;  %vm72_vm13 = vcmp.ne.f32.partialorder %v56_v26, %v56_v26  ;;  %v57_v31 = vld [vmem:[%s1268_s0 + $0x60] sm:$0xff]  ;;  %v58_v32 = vld [vmem:[%s1268_s0 + $0x68] sm:$0xff]  ;;  %v120_v33 = vsel %vm95_vm1, %v684_v29, -inf  ;;  %v59_v37 = vld [vmem:[%s1268_s0 + $0x70] sm:$0xff] }
   0xa   :  { %v123_v34 = vsel %vm95_vm1, %v686_v30, -inf  ;;  %v698_v35 = vsel %vm71_vm12, inf, %v55_v25  ;;  %v700_v36 = vsel %vm72_vm13, inf, %v56_v26  ;;  %vm73_vm14 = vcmp.ne.f32.partialorder %v57_v31, %v57_v31  ;;  %v60_v38 = vld [vmem:[%s1268_s0 + $0x78] sm:$0xff]  ;;  %v728_v50 = vld [vmem:[#allocation2] sm:$0xff]  ;;  %v732_v52 = vld [vmem:[#allocation2 + $0x10] sm:$0xff] }
   0xb   :  { %vm74_vm15 = vcmp.ne.f32.partialorder %v58_v32, %v58_v32  ;;  %v126_v39 = vsel %vm95_vm1, %v698_v35, -inf  ;;  %v129_v40 = vsel %vm95_vm1, %v700_v36, -inf  ;;  %v712_v41 = vsel %vm73_vm14, inf, %v57_v31  ;;  %v750_v57 = vld [vmem:[#allocation2 + $0x8] sm:$0xff]  ;;  %v755_v60 = vld [vmem:[#allocation2 + $0x18] sm:$0xff]  ;;  %v784_v6 = vld [vmem:[#allocation2 + $0x20] sm:$0xff] }
   0xc   :  { %v714_v42 = vsel %vm74_vm15, inf, %v58_v32  ;;  %vm75_vm2 = vcmp.ne.f32.partialorder %v59_v37, %v59_v37  ;;  %vm76_vm3 = vcmp.ne.f32.partialorder %v60_v38, %v60_v38  ;;  %v132_v43 = vsel %vm95_vm1, %v712_v41, -inf  ;;  %v818_v20 = vld [vmem:[#allocation2 + $0x30] sm:$0xff] }
   0xd   :  { %109 = vmax.xlane.f32.xlu0 %v108_v21  ;;  %112 = vmax.xlane.f32.xlu1 %v111_v22  ;;  %v135_v44 = vsel %vm95_vm1, %v714_v42, -inf  ;;  %v720_v45 = vsel %vm75_vm2, inf, %v59_v37  ;;  %v722_v46 = vsel %vm76_vm3, inf, %v60_v38  ;;  %v822_v21 = vld [vmem:[#allocation2 + $0x38] sm:$0xff] }
   0xe   :  { %v138_v47 = vsel %vm95_vm1, %v720_v45, -inf  ;;  %v141_v48 = vsel %vm95_vm1, %v722_v46, -inf }
  0x11   :  { %115 = vmax.xlane.f32.xlu0 %v114_v27  ;;  %118 = vmax.xlane.f32.xlu1 %v117_v28 }
  0x15   :  { %121 = vmax.xlane.f32.xlu0 %v120_v33  ;;  %124 = vmax.xlane.f32.xlu1 %v123_v34 }
  0x19   :  { %127 = vmax.xlane.f32.xlu0 %v126_v39  ;;  %130 = vmax.xlane.f32.xlu1 %v129_v40  ;;  %v860_v39 = vld [vmem:[#allocation2 + $0x48] sm:$0xff] }
  0x1d   :  { %133 = vmax.xlane.f32.xlu0 %v132_v43  ;;  %136 = vmax.xlane.f32.xlu1 %v135_v44 }
  0x21   :  { %139 = vmax.xlane.f32.xlu0 %v138_v47  ;;  %142 = vmax.xlane.f32.xlu1 %v141_v48 }
  0x92   :  { %v734_v53 = vpop.xlane.xlu0 %97  ;;  %v736_v54 = vpop.xlane.xlu1 %103 }
  0x93   :  { %vm144_vm4 = vcmp.eq.f32.partialorder %v634_v7, %v734_v53  ;;  %vm450_vm5 = vcmp.gt.f32.partialorder %v734_v53, %v728_v50  ;;  %v466_v55 = vmax.f32 %v728_v50, %v734_v53  ;;  %vm146_vm6 = vcmp.eq.f32.partialorder %v636_v8, %v736_v54  ;;  %v787_v7 = vld [vmem:[#allocation2 + $0x28] sm:$0xff] }
  0x94   :  { %vm452_vm7 = vcmp.gt.f32.partialorder %v736_v54, %v732_v52  ;;  %v468_v56 = vmax.f32 %v732_v52, %v736_v54  ;;  %v160_v58 = vsel %vm144_vm4, %v730_v51, 16  ;;  %v162_v59 = vsel %vm146_vm6, %v730_v51, 16 }
  0x95   :  { %483 = vst.msk [vmem:[#allocation2] sm:$0xff] %vm12_vm0, %v466_v55  ;;  %v758_v61 = vsel %vm95_vm1, %v160_v58, 2147483647  ;;  %v761_v62 = vsel %vm95_vm1, %v162_v59, 2147483647  ;;  %v894_v59 = vld [vmem:[#allocation2 + $0x50] sm:$0xff] }
  0x96   :  { %485 = vst.msk [vmem:[#allocation2 + $0x10] sm:$0xff] %vm12_vm0, %v468_v56  ;;  %v764_v63 = vpop.xlane.xlu0 %100  ;;  %v766_v0 = vpop.xlane.xlu1 %106  ;;  %v178_v1 = vshra.s32 %v758_v61, 16  ;;  %v208_v2 = vshra.s32 %v761_v62, 16 }
  0x97   :  { %vm145_vm8 = vcmp.eq.f32.partialorder %v638_v9, %v764_v63  ;;  %vm451_vm9 = vcmp.gt.f32.partialorder %v764_v63, %v750_v57  ;;  %v467_v3 = vmax.f32 %v750_v57, %v764_v63  ;;  %vm147_vm10 = vcmp.eq.f32.partialorder %v644_v12, %v766_v0 }
  0x98   :  { %vm453_vm11 = vcmp.gt.f32.partialorder %v766_v0, %v755_v60  ;;  %v469_v4 = vmax.f32 %v755_v60, %v766_v0  ;;  %v782_v5 = vcvt.s32.f32 %v178_v1  ;;  %v161_v8 = vsel %vm145_vm8, %v730_v51, 16 }
  0x99   :  { %484 = vst.msk [vmem:[#allocation2 + $0x8] sm:$0xff] %vm12_vm0, %v467_v3  ;;  %v163_v9 = vsel %vm147_vm10, %v730_v51, 16  ;;  %v797_v12 = vcvt.s32.f32 %v208_v2  ;;  %v800_v13 = vsel %vm95_vm1, %v161_v8, 2147483647  ;;  %v898_v2 = vld [vmem:[#allocation2 + $0x58] sm:$0xff] }
  0x9a   :  { %486 = vst.msk [vmem:[#allocation2 + $0x18] sm:$0xff] %vm12_vm0, %v469_v4  ;;  %181 = vmin.xlane.f32.xlu0 %v782_v5  ;;  %v793_v10 = vpop.xlane.xlu0 %109  ;;  %v795_v11 = vpop.xlane.xlu1 %112  ;;  %v803_v14 = vsel %vm95_vm1, %v163_v9, 2147483647  ;;  %v193_v19 = vshra.s32 %v800_v13, 16  ;;  %1280 = vst [vmem:[#allocation4_spill] sm:$0xff] %v898_v2 }
  0x9b   :  { %vm148_vm12 = vcmp.eq.f32.partialorder %v656_v17, %v793_v10  ;;  %vm454_vm13 = vcmp.gt.f32.partialorder %v793_v10, %v784_v6  ;;  %v470_v15 = vmax.f32 %v784_v6, %v793_v10  ;;  %vm149_vm14 = vcmp.eq.f32.partialorder %v658_v18, %v795_v11 }
  0x9c   :  { %vm455_vm15 = vcmp.gt.f32.partialorder %v795_v11, %v787_v7  ;;  %v471_v16 = vmax.f32 %v787_v7, %v795_v11  ;;  %v223_v17 = vshra.s32 %v803_v14, 16  ;;  %v164_v22 = vsel %vm148_vm12, %v730_v51, 16 }
  0x9d   :  { %487 = vst.msk [vmem:[#allocation2 + $0x20] sm:$0xff] %vm12_vm0, %v470_v15  ;;  %v165_v18 = vsel %vm149_vm14, %v730_v51, 16  ;;  %v828_v25 = vcvt.s32.f32 %v193_v19  ;;  %v837_v31 = vsel %vm95_vm1, %v164_v22, 2147483647 }
  0x9e   :  { %488 = vst.msk [vmem:[#allocation2 + $0x28] sm:$0xff] %vm12_vm0, %v471_v16  ;;  %211 = vmin.xlane.f32.xlu0 %v797_v12  ;;  %v830_v26 = vpop.xlane.xlu0 %115  ;;  %v832_v27 = vpop.xlane.xlu1 %118  ;;  %v834_v28 = vcvt.s32.f32 %v223_v17  ;;  %v840_v32 = vsel %vm95_vm1, %v165_v18, 2147483647  ;;  %v238_v37 = vshra.s32 %v837_v31, 16  ;;  %v932_v18 = vld [vmem:[#allocation2 + $0x60] sm:$0xff] }
  0x9f   :  { %vm150_vm2 = vcmp.eq.f32.partialorder %v670_v23, %v830_v26  ;;  %vm456_vm3 = vcmp.gt.f32.partialorder %v830_v26, %v818_v20  ;;  %v472_v33 = vmax.f32 %v818_v20, %v830_v26  ;;  %vm151_vm4 = vcmp.eq.f32.partialorder %v672_v24, %v832_v27  ;;  %196 = vmin.xlane.f32.xlu1 %v828_v25  ;;  %v856_v23 = vld [vmem:[#allocation2 + $0x40] sm:$0xff] }
  0xa0   :  { %vm457_vm6 = vcmp.gt.f32.partialorder %v832_v27, %v822_v21  ;;  %v473_v34 = vmax.f32 %v822_v21, %v832_v27  ;;  %v253_v38 = vshra.s32 %v840_v32, 16  ;;  %v166_v24 = vsel %vm150_vm2, %v730_v51, 16  ;;  %1282 = vst [vmem:[#allocation6_spill] sm:$0xff] %v932_v18 }
  0xa1   :  { %489 = vst.msk [vmem:[#allocation2 + $0x30] sm:$0xff] %vm12_vm0, %v472_v33  ;;  %v167_v40 = vsel %vm151_vm4, %v730_v51, 16  ;;  %v865_v43 = vcvt.s32.f32 %v238_v37  ;;  %v874_v49 = vsel %vm95_vm1, %v166_v24, 2147483647 }
  0xa2   :  { %490 = vst.msk [vmem:[#allocation2 + $0x38] sm:$0xff] %vm12_vm0, %v473_v34  ;;  %v867_v44 = vpop.xlane.xlu0 %121  ;;  %v869_v47 = vpop.xlane.xlu1 %124  ;;  %v871_v48 = vcvt.s32.f32 %v253_v38  ;;  %v877_v55 = vsel %vm95_vm1, %v167_v40, 2147483647  ;;  %v936_v34 = vld [vmem:[#allocation2 + $0x68] sm:$0xff] }
  0xa3   :  { %vm152_vm8 = vcmp.eq.f32.partialorder %v684_v29, %v867_v44  ;;  %vm458_vm10 = vcmp.gt.f32.partialorder %v867_v44, %v856_v23  ;;  %v474_v56 = vmax.f32 %v856_v23, %v867_v44  ;;  %vm153_vm12 = vcmp.eq.f32.partialorder %v686_v30, %v869_v47  ;;  %226 = vmin.xlane.f32.xlu1 %v834_v28 }
  0xa4   :  { %241 = vmin.xlane.f32.xlu0 %v865_v43  ;;  %vm459_vm14 = vcmp.gt.f32.partialorder %v869_v47, %v860_v39  ;;  %v475_v58 = vmax.f32 %v860_v39, %v869_v47  ;;  %v268_v29 = vshra.s32 %v874_v49, 16  ;;  %v283_v1 = vshra.s32 %v877_v55, 16  ;;  %1283 = vst [vmem:[#allocation7_spill] sm:$0xff] %v936_v34 }
  0xa5   :  { %491 = vst.msk [vmem:[#allocation2 + $0x40] sm:$0xff] %vm12_vm0, %v474_v56  ;;  %v168_v30 = vsel %vm152_vm8, %v730_v51, 16  ;;  %v169_v3 = vsel %vm153_vm12, %v730_v51, 16 }
  0xa6   :  { %492 = vst.msk [vmem:[#allocation2 + $0x48] sm:$0xff] %vm12_vm0, %v475_v58  ;;  %v903_v4 = vcvt.s32.f32 %v268_v29  ;;  %v905_v8 = vpop.xlane.xlu0 %127  ;;  %v907_v9 = vpop.xlane.xlu1 %130  ;;  %v909_v15 = vcvt.s32.f32 %v283_v1  ;;  %v912_v16 = vsel %vm95_vm1, %v168_v30, 2147483647  ;;  %v915_v19 = vsel %vm95_vm1, %v169_v3, 2147483647  ;;  %v970_v3 = vld [vmem:[#allocation2 + $0x70] sm:$0xff] }
  0xa7   :  { %1281 = vst [vmem:[#allocation5_spill] sm:$0xff] %v907_v9  ;;  %vm154_vm2 = vcmp.eq.f32.partialorder %v698_v35, %v905_v8  ;;  %v476_v17 = vmax.f32 %v894_v59, %v905_v8  ;;  %vm155_vm8 = vcmp.eq.f32.partialorder %v700_v36, %v907_v9  ;;  %256 = vmin.xlane.f32.xlu1 %v871_v48  ;;  %v298_v35 = vshra.s32 %v912_v16, 16 }
  0xa8   :  { %271 = vmin.xlane.f32.xlu0 %v903_v4  ;;  %v477_v22 = vmax.f32 %v898_v2, %v907_v9  ;;  %v313_v33 = vshra.s32 %v915_v19, 16  ;;  %v170_v36 = vsel %vm154_vm2, %v730_v51, 16  ;;  %v171_v37 = vsel %vm155_vm8, %v730_v51, 16  ;;  %1286 = vst [vmem:[#allocation10_spill] sm:$0xff] %v970_v3 }
  0xa9   :  { %493 = vst.msk [vmem:[#allocation2 + $0x50] sm:$0xff] %vm12_vm0, %v476_v17  ;;  %v941_v38 = vcvt.s32.f32 %v298_v35  ;;  %v950_v58 = vsel %vm95_vm1, %v170_v36, 2147483647  ;;  %v953_v29 = vsel %vm95_vm1, %v171_v37, 2147483647 }
  0xaa   :  { %494 = vst.msk [vmem:[#allocation2 + $0x58] sm:$0xff] %vm12_vm0, %v477_v22  ;;  %v943_v24 = vpop.xlane.xlu0 %133  ;;  %v945_v40 = vpop.xlane.xlu1 %136  ;;  %v947_v56 = vcvt.s32.f32 %v313_v33  ;;  %v343_v17 = vshra.s32 %v953_v29, 16  ;;  %v974_v22 = vld [vmem:[#allocation2 + $0x78] sm:$0xff] }
  0xab   :  { %1284 = vst [vmem:[#allocation8_spill] sm:$0xff] %v943_v24  ;;  %1285 = vst [vmem:[#allocation9_spill] sm:$0xff] %v945_v40  ;;  %vm156_vm2 = vcmp.eq.f32.partialorder %v712_v41, %v943_v24  ;;  %vm462_vm8 = vcmp.gt.f32.partialorder %v943_v24, %v932_v18  ;;  %v478_v1 = vmax.f32 %v932_v18, %v943_v24  ;;  %286 = vmin.xlane.f32.xlu1 %v909_v15 }
  0xac   :  { %vm157_vm12 = vcmp.eq.f32.partialorder %v714_v42, %v945_v40  ;;  %301 = vmin.xlane.f32.xlu0 %v941_v38  ;;  %v479_v30 = vmax.f32 %v936_v34, %v945_v40  ;;  %v328_v41 = vshra.s32 %v950_v58, 16  ;;  %1287 = vst [vmem:[#allocation11_spill] sm:$0xff] %v974_v22  ;;  %v172_v42 = vsel %vm156_vm2, %v730_v51, 16 }
  0xad   :  { %495 = vst.msk [vmem:[#allocation2 + $0x60] sm:$0xff] %vm12_vm0, %v478_v1  ;;  %v173_v35 = vsel %vm157_vm12, %v730_v51, 16  ;;  %v986_v34 = vsel %vm95_vm1, %v172_v42, 2147483647  ;;  %v192_v18 = vand.u32 65535, %v800_v13 }
  0xae   :  { %496 = vst.msk [vmem:[#allocation2 + $0x68] sm:$0xff] %vm12_vm0, %v479_v30  ;;  %v979_v33 = vcvt.s32.f32 %v328_v41  ;;  %v981_v36 = vpop.xlane.xlu0 %139  ;;  %v983_v37 = vpop.xlane.xlu1 %142  ;;  %v989_v40 = vsel %vm95_vm1, %v173_v35, 2147483647  ;;  %v1001_v41 = vcvt.s32.f32 %v343_v17  ;;  %v358_v42 = vshra.s32 %v986_v34, 16 }
  0xaf   :  { %1288 = vst [vmem:[#allocation12_spill] sm:$0xff] %v981_v36  ;;  %1289 = vst [vmem:[#allocation13_spill] sm:$0xff] %v983_v37  ;;  %vm158_vm4 = vcmp.eq.f32.partialorder %v720_v45, %v981_v36  ;;  %v480_v1 = vmax.f32 %v970_v3, %v981_v36  ;;  %vm159_vm12 = vcmp.eq.f32.partialorder %v722_v46, %v983_v37  ;;  %316 = vmin.xlane.f32.xlu1 %v947_v56 }
  0xb0   :  { %331 = vmin.xlane.f32.xlu0 %v979_v33  ;;  %v481_v30 = vmax.f32 %v974_v22, %v983_v37  ;;  %v373_v35 = vshra.s32 %v989_v40, 16  ;;  %v174_v45 = vsel %vm158_vm4, %v730_v51, 16  ;;  %v175_v36 = vsel %vm159_vm12, %v730_v51, 16 }
  0xb1   :  { %497 = vst.msk [vmem:[#allocation2 + $0x70] sm:$0xff] %vm12_vm0, %v480_v1  ;;  %v1009_v46 = vcvt.s32.f32 %v358_v42  ;;  %v1012_v3 = vsel %vm95_vm1, %v174_v45, 2147483647  ;;  %v1015_v17 = vsel %vm95_vm1, %v175_v36, 2147483647  ;;  %v589_v36 = vmov 0  }
  0xb2   :  { %498 = vst.msk [vmem:[#allocation2 + $0x78] sm:$0xff] %vm12_vm0, %v481_v30  ;;  %v388_v37 = vshra.s32 %v1012_v3, 16  ;;  %v1020_v1 = vcvt.s32.f32 %v373_v35  ;;  %v403_v51 = vshra.s32 %v1015_v17, 16  ;;  %29 = vst.msk [vmem:[#allocation3] sm:$0xff] %vm12_vm0, %v589_v36  ;;  %v207_v45 = vand.u32 65535, %v761_v62 }
  0xb3   :  { %346 = vmin.xlane.f32.xlu1 %v1001_v41  ;;  %30 = vst.msk [vmem:[#allocation3 + $0x8] sm:$0xff] %vm12_vm0, %v589_v36  ;;  %31 = vst.msk [vmem:[#allocation3 + $0x10] sm:$0xff] %vm12_vm0, %v589_v36  ;;  %v237_v62 = vand.u32 65535, %v837_v31 }
  0xb4   :  { %361 = vmin.xlane.f32.xlu0 %v1009_v46  ;;  %v1023_v22 = vcvt.s32.f32 %v388_v37  ;;  %v1027_v30 = vcvt.s32.f32 %v403_v51  ;;  %32 = vst.msk [vmem:[#allocation3 + $0x18] sm:$0xff] %vm12_vm0, %v589_v36  ;;  %33 = vst.msk [vmem:[#allocation3 + $0x20] sm:$0xff] %vm12_vm0, %v589_v36  ;;  %v177_v37 = vand.u32 65535, %v758_v61  ;;  %v209_v2 = vcvt.s32.f32 %v207_v45 }
  0xb5   :  { %34 = vst.msk [vmem:[#allocation3 + $0x28] sm:$0xff] %vm12_vm0, %v589_v36  ;;  %35 = vst.msk [vmem:[#allocation3 + $0x30] sm:$0xff] %vm12_vm0, %v589_v36  ;;  %v194_v61 = vcvt.s32.f32 %v192_v18 }
  0xb6   :  { %36 = vst.msk [vmem:[#allocation3 + $0x38] sm:$0xff] %vm12_vm0, %v589_v36  ;;  %37 = vst.msk [vmem:[#allocation3 + $0x40] sm:$0xff] %vm12_vm0, %v589_v36  ;;  %v179_v35 = vcvt.s32.f32 %v177_v37  ;;  %v222_v37 = vand.u32 65535, %v803_v14 }
  0xb7   :  { %376 = vmin.xlane.f32.xlu1 %v1020_v1  ;;  %38 = vst.msk [vmem:[#allocation3 + $0x48] sm:$0xff] %vm12_vm0, %v589_v36  ;;  %39 = vst.msk [vmem:[#allocation3 + $0x50] sm:$0xff] %vm12_vm0, %v589_v36 }
  0xb8   :  { %391 = vmin.xlane.f32.xlu0 %v1023_v22  ;;  %40 = vst.msk [vmem:[#allocation3 + $0x58] sm:$0xff] %vm12_vm0, %v589_v36  ;;  %41 = vst.msk [vmem:[#allocation3 + $0x60] sm:$0xff] %vm12_vm0, %v589_v36  ;;  %v224_v45 = vcvt.s32.f32 %v222_v37 }
  0xb9   :  { %42 = vst.msk [vmem:[#allocation3 + $0x68] sm:$0xff] %vm12_vm0, %v589_v36  ;;  %43 = vst.msk [vmem:[#allocation3 + $0x70] sm:$0xff] %vm12_vm0, %v589_v36 }
  0xba   :  { %44 = vst.msk [vmem:[#allocation3 + $0x78] sm:$0xff] %vm12_vm0, %v589_v36 }
  0xbb   :  { %406 = vmin.xlane.f32.xlu1 %v1027_v30  ;;  %v502_v52 = vld [vmem:[#allocation3 + $0x18] sm:$0xff]  ;;  %v503_v54 = vld [vmem:[#allocation3 + $0x20] sm:$0xff] }
  0xbe   :  { %v508_v21 = vld [vmem:[#allocation3 + $0x48] sm:$0xff]  ;;  %v509_v27 = vld [vmem:[#allocation3 + $0x50] sm:$0xff] }
  0xbf   :  { %v510_v39 = vld [vmem:[#allocation3 + $0x58] sm:$0xff]  ;;  %v511_v47 = vld [vmem:[#allocation3 + $0x60] sm:$0xff] }
 0x127   :  { %v1047_v42 = vpop.xlane.xlu0 %181 }
 0x128   :  { %vm183_vm1 = vcmp.eq.f32.partialorder %v782_v5, %v1047_v42 }
 0x129   :  { %v184_v51 = vsel %vm183_vm1, %v179_v35, inf }
 0x12a   :  { %185 = vmin.xlane.f32.xlu0 %v184_v51  ;;  %v252_v51 = vand.u32 65535, %v840_v32  ;;  %v282_v32 = vand.u32 65535, %v877_v55  ;;  %v312_v55 = vand.u32 65535, %v915_v19  ;;  %v342_v19 = vand.u32 65535, %v953_v29 }
 0x12b   :  { %v1053_v24 = vpop.xlane.xlu0 %211  ;;  %v372_v29 = vand.u32 65535, %v989_v40  ;;  %v402_v40 = vand.u32 65535, %v1015_v17  ;;  %v188_v17 = vcvt.f32.s32 %v1047_v42 }
 0x12c   :  { %vm213_vm4 = vcmp.eq.f32.partialorder %v797_v12, %v1053_v24  ;;  %v1057_v36 = vpop.xlane.xlu1 %196  ;;  %v239_v12 = vcvt.s32.f32 %v237_v62  ;;  %v254_v18 = vcvt.s32.f32 %v252_v51 }
 0x12d   :  { %v214_v9 = vsel %vm213_vm4, %v209_v2, inf  ;;  %vm198_vm2 = vcmp.eq.f32.partialorder %v828_v25, %v1057_v36  ;;  %v267_v2 = vand.u32 65535, %v874_v49  ;;  %v297_v49 = vand.u32 65535, %v912_v16 }
 0x12e   :  { %215 = vmin.xlane.f32.xlu0 %v214_v9  ;;  %v199_v5 = vsel %vm198_vm2, %v194_v61, inf  ;;  %v327_v16 = vand.u32 65535, %v950_v58  ;;  %v357_v58 = vand.u32 65535, %v986_v34  ;;  %v387_v34 = vand.u32 65535, %v1012_v3 }
 0x12f   :  { %200 = vmin.xlane.f32.xlu1 %v199_v5  ;;  %v269_v61 = vcvt.s32.f32 %v267_v2  ;;  %v284_v5 = vcvt.s32.f32 %v282_v32  ;;  %v314_v2 = vcvt.s32.f32 %v312_v55 }
 0x130   :  { %v1063_v13 = vpop.xlane.xlu1 %226  ;;  %v359_v32 = vcvt.s32.f32 %v357_v58 }
 0x131   :  { %v1065_v35 = vpop.xlane.xlu0 %241  ;;  %vm228_vm12 = vcmp.eq.f32.partialorder %v834_v28, %v1063_v13 }
 0x132   :  { %vm243_vm1 = vcmp.eq.f32.partialorder %v865_v43, %v1065_v35  ;;  %v229_v14 = vsel %vm228_vm12, %v224_v45, inf  ;;  %v299_v45 = vcvt.s32.f32 %v297_v49 }
 0x133   :  { %v244_v25 = vsel %vm243_vm1, %v239_v12, inf  ;;  %230 = vmin.xlane.f32.xlu1 %v229_v14  ;;  %v329_v14 = vcvt.s32.f32 %v327_v16 }
 0x134   :  { %245 = vmin.xlane.f32.xlu0 %v244_v25  ;;  %v1073_v31 = vpop.xlane.xlu1 %256 }
 0x135   :  { %v1075_v9 = vpop.xlane.xlu0 %271  ;;  %vm258_vm4 = vcmp.eq.f32.partialorder %v871_v48, %v1073_v31  ;;  %v263_v53 = vcvt.f32.s32 %v1073_v31 }
 0x136   :  { %vm273_vm2 = vcmp.eq.f32.partialorder %v903_v4, %v1075_v9  ;;  %v259_v28 = vsel %vm258_vm4, %v254_v18, inf }
 0x137   :  { %v274_v43 = vsel %vm273_vm2, %v269_v61, inf  ;;  %260 = vmin.xlane.f32.xlu1 %v259_v28  ;;  %v344_v61 = vcvt.s32.f32 %v342_v19 }
 0x138   :  { %275 = vmin.xlane.f32.xlu0 %v274_v43  ;;  %v1083_v37 = vpop.xlane.xlu1 %286  ;;  %v374_v43 = vcvt.s32.f32 %v372_v29 }
 0x139   :  { %v1085_v62 = vpop.xlane.xlu0 %301  ;;  %vm288_vm12 = vcmp.eq.f32.partialorder %v909_v15, %v1083_v37 }
 0x13a   :  { %vm303_vm1 = vcmp.eq.f32.partialorder %v941_v38, %v1085_v62  ;;  %v289_v48 = vsel %vm288_vm12, %v284_v5, inf  ;;  %v389_v5 = vcvt.s32.f32 %v387_v34 }
 0x13b   :  { %v304_v4 = vsel %vm303_vm1, %v299_v45, inf  ;;  %290 = vmin.xlane.f32.xlu1 %v289_v48  ;;  %v404_v45 = vcvt.s32.f32 %v402_v40  ;;  %v189_v48 = vshll.u32 %v188_v17, 16  ;;  %v264_v17 = vshll.u32 %v263_v53, 16 }
 0x13c   :  { %305 = vmin.xlane.f32.xlu0 %v304_v4  ;;  %v1093_v12 = vpop.xlane.xlu1 %316 }
 0x13d   :  { %v1095_v51 = vpop.xlane.xlu0 %331  ;;  %vm318_vm4 = vcmp.eq.f32.partialorder %v947_v56, %v1093_v12  ;;  %v323_v60 = vcvt.f32.s32 %v1093_v12 }
 0x13e   :  { %vm333_vm2 = vcmp.eq.f32.partialorder %v979_v33, %v1095_v51  ;;  %v319_v15 = vsel %vm318_vm4, %v314_v2, inf  ;;  %v203_v2 = vcvt.f32.s32 %v1057_v36  ;;  %v500_v36 = vld [vmem:[#allocation3 + $0x8] sm:$0xff]  ;;  %v338_v0 = vcvt.f32.s32 %v1095_v51  ;;  %v506_v51 = vld [vmem:[#allocation3 + $0x38] sm:$0xff] }
 0x13f   :  { %v334_v38 = vsel %vm333_vm2, %v329_v14, inf  ;;  %320 = vmin.xlane.f32.xlu1 %v319_v15  ;;  %v324_v11 = vshll.u32 %v323_v60, 16  ;;  %v1296_v60 = vld [vmem:[#allocation10_spill] sm:$0xff] }
 0x140   :  { %335 = vmin.xlane.f32.xlu0 %v334_v38  ;;  %v1103_v25 = vpop.xlane.xlu1 %346  ;;  %v233_v38 = vcvt.f32.s32 %v1063_v13  ;;  %v278_v13 = vcvt.f32.s32 %v1075_v9 }
 0x141   :  { %v1105_v18 = vpop.xlane.xlu0 %361  ;;  %vm348_vm12 = vcmp.eq.f32.partialorder %v1001_v41, %v1103_v25  ;;  %v353_v20 = vcvt.f32.s32 %v1103_v25 }
 0x142   :  { %vm363_vm1 = vcmp.eq.f32.partialorder %v1009_v46, %v1105_v18  ;;  %v349_v56 = vsel %vm348_vm12, %v344_v61, inf  ;;  %v501_v61 = vld [vmem:[#allocation3 + $0x10] sm:$0xff]  ;;  %v234_v50 = vshll.u32 %v233_v38, 16  ;;  %v279_v9 = vshll.u32 %v278_v13, 16 }
 0x143   :  { %v364_v33 = vsel %vm363_vm1, %v359_v32, inf  ;;  %350 = vmin.xlane.f32.xlu1 %v349_v56  ;;  %v204_v32 = vshll.u32 %v203_v2, 16  ;;  %v368_v26 = vcvt.f32.s32 %v1105_v18  ;;  %v354_v25 = vshll.u32 %v353_v20, 16 }
 0x144   :  { %365 = vmin.xlane.f32.xlu0 %v364_v33  ;;  %v1113_v49 = vpop.xlane.xlu1 %376 }
 0x145   :  { %v1115_v28 = vpop.xlane.xlu0 %391  ;;  %vm378_vm4 = vcmp.eq.f32.partialorder %v1020_v1, %v1113_v49  ;;  %v218_v1 = vcvt.f32.s32 %v1053_v24  ;;  %v248_v24 = vcvt.f32.s32 %v1065_v35  ;;  %v369_v18 = vshll.u32 %v368_v26, 16 }
 0x146   :  { %vm393_vm2 = vcmp.eq.f32.partialorder %v1023_v22, %v1115_v28  ;;  %v379_v3 = vsel %vm378_vm4, %v374_v43, inf  ;;  %v499_v22 = vld [vmem:[#allocation3] sm:$0xff] }
 0x147   :  { %v394_v41 = vsel %vm393_vm2, %v389_v5, inf  ;;  %380 = vmin.xlane.f32.xlu1 %v379_v3  ;;  %v219_v58 = vshll.u32 %v218_v1, 16  ;;  %v249_v40 = vshll.u32 %v248_v24, 16  ;;  %v507_v24 = vld [vmem:[#allocation3 + $0x40] sm:$0xff] }
 0x148   :  { %395 = vmin.xlane.f32.xlu0 %v394_v41  ;;  %v1122_v46 = vpop.xlane.xlu1 %406 }
 0x149   :  { %vm408_vm12 = vcmp.eq.f32.partialorder %v1027_v30, %v1122_v46 }
 0x14a   :  { %v409_v55 = vsel %vm408_vm12, %v404_v45, inf }
 0x14b   :  { %410 = vmin.xlane.f32.xlu1 %v409_v55 }
 0x1b7   :  { %v186_v16 = vpop.xlane.xlu0 %185 }
 0x1b8   :  { %v187_v4 = vcvt.f32.s32 %v186_v16  ;;  %v293_v16 = vcvt.f32.s32 %v1083_v37  ;;  %v504_v37 = vld [vmem:[#allocation3 + $0x28] sm:$0xff] }
 0x1ba   :  { %v190_v14 = vadd.s32 %v189_v48, %v187_v4  ;;  %v308_v48 = vcvt.f32.s32 %v1085_v62  ;;  %v505_v62 = vld [vmem:[#allocation3 + $0x30] sm:$0xff] }
 0x1bb   :  { %v216_v19 = vpop.xlane.xlu0 %215 }
 0x1bc   :  { %v515_v15 = vsel %vm450_vm5, %v190_v14, %v499_v22  ;;  %v217_v30 = vcvt.f32.s32 %v216_v19  ;;  %v201_v42 = vpop.xlane.xlu1 %200  ;;  %vm1290_vm5 = vcmp.gt.f32.partialorder %v905_v8, %v894_v59 }
 0x1bd   :  { %531 = vst.msk [vmem:[#allocation3] sm:$0xff] %vm12_vm0, %v515_v15  ;;  %v202_v29 = vcvt.f32.s32 %v201_v42  ;;  %v294_v15 = vshll.u32 %v293_v16, 16 }
 0x1be   :  { %v220_v34 = vadd.s32 %v219_v58, %v217_v30  ;;  %v309_v30 = vshll.u32 %v308_v48, 16 }
 0x1bf   :  { %v205_v56 = vadd.s32 %v204_v32, %v202_v29 }
 0x1c0   :  { %v517_v33 = vsel %vm452_vm7, %v220_v34, %v501_v61  ;;  %v231_v43 = vpop.xlane.xlu1 %230  ;;  %v339_v34 = vshll.u32 %v338_v0, 16  ;;  %v1297_v0 = vld [vmem:[#allocation12_spill] sm:$0xff] }
 0x1c1   :  { %533 = vst.msk [vmem:[#allocation3 + $0x10] sm:$0xff] %vm12_vm0, %v517_v33  ;;  %v246_v5 = vpop.xlane.xlu0 %245  ;;  %v516_v35 = vsel %vm451_vm9, %v205_v56, %v500_v36  ;;  %v232_v3 = vcvt.f32.s32 %v231_v43  ;;  %vm464_vm9 = vcmp.gt.f32.partialorder %v1297_v0, %v1296_v60 }
 0x1c2   :  { %v247_v41 = vcvt.f32.s32 %v246_v5  ;;  %532 = vst.msk [vmem:[#allocation3 + $0x8] sm:$0xff] %vm12_vm0, %v516_v35  ;;  %v398_v35 = vcvt.f32.s32 %v1115_v28 }
 0x1c3   :  { %v235_v55 = vadd.s32 %v234_v50, %v232_v3 }
 0x1c4   :  { %v550_v45 = vld [vmem:[#allocation3] sm:$0xff]  ;;  %v250_v31 = vadd.s32 %v249_v40, %v247_v41  ;;  %v261_v57 = vpop.xlane.xlu1 %260  ;;  %v383_v40 = vcvt.f32.s32 %v1113_v49  ;;  %v399_v28 = vshll.u32 %v398_v35, 16 }
 0x1c5   :  { %566 = vst.msk [vmem:[%s1269_s1] sm:$0xff] %vm12_vm0, %v550_v45  ;;  %v276_v63 = vpop.xlane.xlu0 %275  ;;  %v518_v1 = vsel %vm453_vm11, %v235_v55, %v502_v52  ;;  %v262_v22 = vcvt.f32.s32 %v261_v57 }
 0x1c6   :  { %v519_v4 = vsel %vm454_vm13, %v250_v31, %v503_v54  ;;  %v277_v2 = vcvt.f32.s32 %v276_v63  ;;  %534 = vst.msk [vmem:[#allocation3 + $0x18] sm:$0xff] %vm12_vm0, %v518_v1  ;;  %v384_v49 = vshll.u32 %v383_v40, 16  ;;  %v1291_v1 = vld [vmem:[#allocation5_spill] sm:$0xff] }
 0x1c7   :  { %535 = vst.msk [vmem:[#allocation3 + $0x20] sm:$0xff] %vm12_vm0, %v519_v4  ;;  %v265_v19 = vadd.s32 %v264_v17, %v262_v22  ;;  %v1292_v4 = vld [vmem:[#allocation4_spill] sm:$0xff] }
 0x1c8   :  { %v552_v14 = vld [vmem:[#allocation3 + $0x10] sm:$0xff]  ;;  %v280_v58 = vadd.s32 %v279_v9, %v277_v2  ;;  %v291_v6 = vpop.xlane.xlu1 %290  ;;  %v413_v9 = vcvt.f32.s32 %v1122_v46  ;;  %vm1293_vm7 = vcmp.gt.f32.partialorder %v1291_v1, %v1292_v4  ;;  %v512_v46 = vld [vmem:[#allocation3 + $0x68] sm:$0xff] }
 0x1c9   :  { %568 = vst.msk [vmem:[%s1269_s1 + $0x10] sm:$0xff] %vm12_vm0, %v552_v14  ;;  %v306_v10 = vpop.xlane.xlu0 %305  ;;  %v551_v38 = vld [vmem:[#allocation3 + $0x8] sm:$0xff]  ;;  %v520_v42 = vsel %vm455_vm15, %v265_v19, %v504_v37  ;;  %v292_v32 = vcvt.f32.s32 %v291_v6 }
 0x1ca   :  { %v521_v61 = vsel %vm456_vm3, %v280_v58, %v505_v62  ;;  %v307_v12 = vcvt.f32.s32 %v306_v10  ;;  %567 = vst.msk [vmem:[%s1269_s1 + $0x8] sm:$0xff] %vm12_vm0, %v551_v38  ;;  %536 = vst.msk [vmem:[#allocation3 + $0x28] sm:$0xff] %vm12_vm0, %v520_v42  ;;  %v513_v58 = vld [vmem:[#allocation3 + $0x70] sm:$0xff]  ;;  %v414_v10 = vshll.u32 %v413_v9, 16 }
 0x1cb   :  { %537 = vst.msk [vmem:[#allocation3 + $0x30] sm:$0xff] %vm12_vm0, %v521_v61  ;;  %v295_v29 = vadd.s32 %v294_v15, %v292_v32  ;;  %v1298_v61 = vld [vmem:[#allocation9_spill] sm:$0xff]  ;;  %v1299_v32 = vld [vmem:[#allocation7_spill] sm:$0xff] }
 0x1cc   :  { %v310_v7 = vadd.s32 %v309_v30, %v307_v12  ;;  %v321_v36 = vpop.xlane.xlu1 %320  ;;  %vm1300_vm11 = vcmp.gt.f32.partialorder %v1298_v61, %v1299_v32 }
 0x1cd   :  { %v336_v56 = vpop.xlane.xlu0 %335  ;;  %v553_v33 = vld [vmem:[#allocation3 + $0x18] sm:$0xff]  ;;  %v522_v53 = vsel %vm457_vm6, %v295_v29, %v506_v51  ;;  %v322_v43 = vcvt.f32.s32 %v321_v36 }
 0x1ce   :  { %v554_v50 = vld [vmem:[#allocation3 + $0x20] sm:$0xff]  ;;  %v523_v13 = vsel %vm458_vm10, %v310_v7, %v507_v24  ;;  %v337_v5 = vcvt.f32.s32 %v336_v56  ;;  %569 = vst.msk [vmem:[%s1269_s1 + $0x18] sm:$0xff] %vm12_vm0, %v553_v33  ;;  %538 = vst.msk [vmem:[#allocation3 + $0x38] sm:$0xff] %vm12_vm0, %v522_v53  ;;  %v514_v29 = vld [vmem:[#allocation3 + $0x78] sm:$0xff] }
 0x1cf   :  { %570 = vst.msk [vmem:[%s1269_s1 + $0x20] sm:$0xff] %vm12_vm0, %v554_v50  ;;  %539 = vst.msk [vmem:[#allocation3 + $0x40] sm:$0xff] %vm12_vm0, %v523_v13  ;;  %v325_v23 = vadd.s32 %v324_v11, %v322_v43  ;;  %v1301_v11 = vld [vmem:[#allocation11_spill] sm:$0xff] }
 0x1d0   :  { %v340_v44 = vadd.s32 %v339_v34, %v337_v5  ;;  %v351_v3 = vpop.xlane.xlu1 %350  ;;  %v1302_v34 = vld [vmem:[#allocation13_spill] sm:$0xff] }
 0x1d1   :  { %v366_v41 = vpop.xlane.xlu0 %365  ;;  %v555_v52 = vld [vmem:[#allocation3 + $0x28] sm:$0xff]  ;;  %v524_v45 = vsel %vm459_vm14, %v325_v23, %v508_v21  ;;  %v352_v31 = vcvt.f32.s32 %v351_v3  ;;  %vm465_vm13 = vcmp.gt.f32.partialorder %v1302_v34, %v1301_v11 }
 0x1d2   :  { %v556_v54 = vld [vmem:[#allocation3 + $0x30] sm:$0xff]  ;;  %v525_v55 = vsel %vm1290_vm5, %v340_v44, %v509_v27  ;;  %v367_v17 = vcvt.f32.s32 %v366_v41  ;;  %571 = vst.msk [vmem:[%s1269_s1 + $0x28] sm:$0xff] %vm12_vm0, %v555_v52  ;;  %540 = vst.msk [vmem:[#allocation3 + $0x48] sm:$0xff] %vm12_vm0, %v524_v45 }
 0x1d3   :  { %572 = vst.msk [vmem:[%s1269_s1 + $0x30] sm:$0xff] %vm12_vm0, %v556_v54  ;;  %541 = vst.msk [vmem:[#allocation3 + $0x50] sm:$0xff] %vm12_vm0, %v525_v55  ;;  %v355_v59 = vadd.s32 %v354_v25, %v352_v31 }
 0x1d4   :  { %v370_v8 = vadd.s32 %v369_v18, %v367_v17  ;;  %v381_v16 = vpop.xlane.xlu1 %380 }
 0x1d5   :  { %v396_v48 = vpop.xlane.xlu0 %395  ;;  %v557_v57 = vld [vmem:[#allocation3 + $0x38] sm:$0xff]  ;;  %v526_v22 = vsel %vm1293_vm7, %v355_v59, %v510_v39  ;;  %v382_v14 = vcvt.f32.s32 %v381_v16 }
 0x1d6   :  { %v558_v63 = vld [vmem:[#allocation3 + $0x40] sm:$0xff]  ;;  %v527_v62 = vsel %vm462_vm8, %v370_v8, %v511_v47  ;;  %v397_v19 = vcvt.f32.s32 %v396_v48  ;;  %573 = vst.msk [vmem:[%s1269_s1 + $0x38] sm:$0xff] %vm12_vm0, %v557_v57  ;;  %542 = vst.msk [vmem:[#allocation3 + $0x58] sm:$0xff] %vm12_vm0, %v526_v22 }
 0x1d7   :  { %574 = vst.msk [vmem:[%s1269_s1 + $0x40] sm:$0xff] %vm12_vm0, %v558_v63  ;;  %543 = vst.msk [vmem:[#allocation3 + $0x60] sm:$0xff] %vm12_vm0, %v527_v62  ;;  %v385_v15 = vadd.s32 %v384_v49, %v382_v14 }
 0x1d8   :  { %v400_v30 = vadd.s32 %v399_v28, %v397_v19  ;;  %v411_v6 = vpop.xlane.xlu1 %410 }
 0x1d9   :  { %v559_v38 = vld [vmem:[#allocation3 + $0x48] sm:$0xff]  ;;  %v528_v12 = vsel %vm1300_vm11, %v385_v15, %v512_v46  ;;  %v412_v24 = vcvt.f32.s32 %v411_v6 }
 0x1da   :  { %v560_v42 = vld [vmem:[#allocation3 + $0x50] sm:$0xff]  ;;  %v529_v51 = vsel %vm464_vm9, %v400_v30, %v513_v58  ;;  %575 = vst.msk [vmem:[%s1269_s1 + $0x48] sm:$0xff] %vm12_vm0, %v559_v38  ;;  %544 = vst.msk [vmem:[#allocation3 + $0x68] sm:$0xff] %vm12_vm0, %v528_v12 }
 0x1db   :  { %576 = vst.msk [vmem:[%s1269_s1 + $0x50] sm:$0xff] %vm12_vm0, %v560_v42  ;;  %545 = vst.msk [vmem:[#allocation3 + $0x70] sm:$0xff] %vm12_vm0, %v529_v51  ;;  %v415_v7 = vadd.s32 %v414_v10, %v412_v24 }
 0x1dd   :  { %v561_v20 = vld [vmem:[#allocation3 + $0x58] sm:$0xff]  ;;  %v530_v36 = vsel %vm465_vm13, %v415_v7, %v514_v29 }
 0x1de   :  { %v562_v26 = vld [vmem:[#allocation3 + $0x60] sm:$0xff]  ;;  %577 = vst.msk [vmem:[%s1269_s1 + $0x58] sm:$0xff] %vm12_vm0, %v561_v20  ;;  %546 = vst.msk [vmem:[#allocation3 + $0x78] sm:$0xff] %vm12_vm0, %v530_v36 }
 0x1df   :  { %578 = vst.msk [vmem:[%s1269_s1 + $0x60] sm:$0xff] %vm12_vm0, %v562_v26 }
 0x1e1   :  { %v563_v56 = vld [vmem:[#allocation3 + $0x68] sm:$0xff] }
 0x1e2   :  { %v564_v33 = vld [vmem:[#allocation3 + $0x70] sm:$0xff]  ;;  %579 = vst.msk [vmem:[%s1269_s1 + $0x68] sm:$0xff] %vm12_vm0, %v563_v56 }
 0x1e3   :  { %580 = vst.msk [vmem:[%s1269_s1 + $0x70] sm:$0xff] %vm12_vm0, %v564_v33 }
 0x1e5   :  { %v565_v50 = vld [vmem:[#allocation3 + $0x78] sm:$0xff] }
 0x1e6   :  { %581 = vst.msk [vmem:[%s1269_s1 + $0x78] sm:$0xff] %vm12_vm0, %v565_v50 }

</bundles_post_ra>
